<compile_context>
chip_gen: v5e
topology: v5e:2x2
jax: 0.10.0
libtpu: 0.0.40
codegen_flags: <defaults>
</compile_context>

<pallas_src>
import math

import jax
import jax.numpy as jnp
from jax.experimental import pallas as pl
from jax.experimental.pallas import tpu as pltpu


# ----------------------------------------------------------------------------
# helpers
# ----------------------------------------------------------------------------
def _largest_divisor_tile(dim, target, mult):
    """Largest tile <= target that divides `dim` and is a multiple of `mult`.
    Falls back to the full dim (always a legal block size)."""
    if dim <= target:
        return dim
    for t in range(min(target, dim), mult - 1, -1):
        if dim % t == 0 and t % mult == 0:
            return t
    return dim


def _sublane_mult(dtype):
    """Sublane multiple for a dtype: 8 for f32, 16 for bf16, 32 for int8."""
    return max(8, 32 // jnp.dtype(dtype).itemsize)


def _vmem_limit(est_bytes):
    """Explicit scoped-VMEM limit: estimate * 2 (double buffering) + headroom,
    capped at 3/4 of the physical per-core VMEM (fallback 48 MiB)."""
    cap = 48 << 20
    try:
        cap = int(pltpu.get_tpu_info().vmem_capacity_bytes) * 3 // 4
    except Exception:
        pass
    want = 2 * est_bytes + (4 << 20)
    return int(min(max(want, 32 << 20), cap))


def _pick_head_block(n_head, d):
    """Smallest divisor of n_head whose packed lane width (Hb*d) reaches 128;
    falls back to all heads."""
    for hb in range(1, n_head + 1):
        if n_head % hb == 0 and hb * d >= 128:
            return hb
    return n_head


# ----------------------------------------------------------------------------
# tiled matmul kernel (QKV and output projections)
# ----------------------------------------------------------------------------
def _matmul_kernel(x_ref, w_ref, o_ref, acc_ref):
    @pl.when(pl.program_id(2) == 0)
    def _():
        acc_ref[...] = jnp.zeros_like(acc_ref)

    acc_ref[...] += jnp.dot(x_ref[...], w_ref[...],
                            preferred_element_type=jnp.float32)

    @pl.when(pl.program_id(2) == pl.num_programs(2) - 1)
    def _():
        o_ref[...] = acc_ref[...].astype(o_ref.dtype)


def pallas_matmul(x, w, *, tm_target=512, tn_target=256, tk_target=512):
    """x: (M, K), w: (K, N) -> (M, N) in x.dtype, f32 accumulation."""
    M, K = x.shape
    K2, N = w.shape
    assert K == K2
    sub = _sublane_mult(x.dtype)
    tm = _largest_divisor_tile(M, tm_target, sub)
    tn = _largest_divisor_tile(N, tn_target, 128)
    tk = _largest_divisor_tile(K, tk_target, 128)

    bx = jnp.dtype(x.dtype).itemsize
    bw = jnp.dtype(w.dtype).itemsize
    est = tm * tk * bx + tk * tn * bw + tm * tn * bx + tm * tn * 4

    return pl.pallas_call(
        _matmul_kernel,
        out_shape=jax.ShapeDtypeStruct((M, N), x.dtype),
        grid_spec=pltpu.PrefetchScalarGridSpec(
            num_scalar_prefetch=0,
            grid=(M // tm, N // tn, K // tk),
            in_specs=[
                pl.BlockSpec((tm, tk), lambda i, j, k: (i, k)),
                pl.BlockSpec((tk, tn), lambda i, j, k: (k, j)),
            ],
            out_specs=pl.BlockSpec((tm, tn), lambda i, j, k: (i, j)),
            scratch_shapes=[pltpu.VMEM((tm, tn), jnp.float32)],
        ),
        compiler_params=pltpu.CompilerParams(
            dimension_semantics=("parallel", "parallel", "arbitrary"),
            vmem_limit_bytes=_vmem_limit(est)),
    )(x, w)


# ----------------------------------------------------------------------------
# rotary pre-rotation kernel (applied once to q and k; scale folded into q)
# ----------------------------------------------------------------------------
def _rotary_kernel(cos_ref, sin_ref, x_ref, o_ref):
    c = cos_ref[0]                        # (t, d/2) f32
    s = sin_ref[0]
    x = x_ref[0].astype(jnp.float32)      # (t, d)
    d2 = c.shape[-1]
    x1 = x[:, :d2]
    x2 = x[:, d2:]
    y1 = x1 * c + x2 * s
    y2 = x2 * c - x1 * s
    o_ref[0] = jnp.concatenate([y1, y2], axis=-1).astype(o_ref.dtype)


def pallas_rotary_qk(q, k, cos, sin, scale):
    """q, k: (BH, T, d); cos/sin: (T, d//2).
    Returns (scale * rot(q), rot(k)); the scale rides inside q's tables."""
    bh, T, d = q.shape
    d2 = d // 2
    qk = jnp.concatenate([q, k], axis=0)              # (2*BH, T, d)
    cos2 = jnp.stack([cos * scale, cos], axis=0)      # (2, T, d/2): row0 -> q
    sin2 = jnp.stack([sin * scale, sin], axis=0)

    sub = _sublane_mult(q.dtype)
    tt = _largest_divisor_tile(T, 512, sub)
    bq = jnp.dtype(q.dtype).itemsize
    est = 2 * tt * d2 * 4 + 2 * tt * d * bq

    out = pl.pallas_call(
        _rotary_kernel,
        out_shape=jax.ShapeDtypeStruct(qk.shape, q.dtype),
        grid_spec=pltpu.PrefetchScalarGridSpec(
            num_scalar_prefetch=0,
            grid=(2 * bh, T // tt),
            in_specs=[
                pl.BlockSpec((1, tt, d2), lambda i, t: (i // bh, t, 0)),
                pl.BlockSpec((1, tt, d2), lambda i, t: (i // bh, t, 0)),
                pl.BlockSpec((1, tt, d), lambda i, t: (i, t, 0)),
            ],
            out_specs=pl.BlockSpec((1, tt, d), lambda i, t: (i, t, 0)),
        ),
        compiler_params=pltpu.CompilerParams(
            dimension_semantics=("parallel", "parallel"),
            vmem_limit_bytes=_vmem_limit(est)),
    )(cos2, sin2, qk)
    return out[:bh], out[bh:]


# ----------------------------------------------------------------------------
# flash attention kernel: pre-rotated/pre-scaled q, causal flat schedule
# ----------------------------------------------------------------------------
def _flash_kernel(qi_ref, ki_ref, first_ref, last_ref,     # scalar prefetch
                  q_ref, k_ref, v_ref, o_ref,
                  m_sc, l_sc, acc_sc):
    step = pl.program_id(1)
    hb, tq, d = q_ref.shape[1], q_ref.shape[2], q_ref.shape[3]
    tkv = k_ref.shape[2]

    @pl.when(first_ref[step] == 1)
    def _():
        m_sc[...] = jnp.full_like(m_sc, -jnp.inf)
        l_sc[...] = jnp.zeros_like(l_sc)
        acc_sc[...] = jnp.zeros_like(acc_sc)

    q = q_ref[0]                           # (hb, tq, d) — rotated & scaled
    k = k_ref[0]                           # (hb, tkv, d) — rotated
    s = jnp.einsum("hqd,hkd->hqk", q, k, preferred_element_type=jnp.float32)

    q_start = qi_ref[step] * tq
    kv_start = ki_ref[step] * tkv
    rows = q_start + jax.lax.broadcasted_iota(jnp.int32, (hb, tq, tkv), 1)
    cols = kv_start + jax.lax.broadcasted_iota(jnp.int32, (hb, tq, tkv), 2)
    s = jnp.where(cols <= rows, s, -jnp.inf)

    # online softmax update
    m_prev = m_sc[...]
    m_new = jnp.maximum(m_prev, s.max(axis=-1, keepdims=True))
    alpha = jnp.exp(m_prev - m_new)
    p = jnp.exp(s - m_new)
    l_sc[...] = alpha * l_sc[...] + p.sum(axis=-1, keepdims=True)
    acc_sc[...] = alpha * acc_sc[...] + jnp.einsum(
        "hqk,hkd->hqd", p.astype(v_ref.dtype), v_ref[0],
        preferred_element_type=jnp.float32)
    m_sc[...] = m_new

    @pl.when(last_ref[step] == 1)
    def _():
        o_ref[0] = (acc_sc[...] *
                    pl.reciprocal(l_sc[...], approx=True)).astype(o_ref.dtype)


# ----------------------------------------------------------------------------
# full module forward
# ----------------------------------------------------------------------------
def causal_self_attention(x, w_qkv, w_proj, n_head, *,
                          tq_target=256, tkv_target=512):
    """x: (B, T, C). w_qkv: (C, 3C), w_proj: (C, C) (i.e. torch weight.T)."""
    B, T, C = x.shape
    assert C % n_head == 0
    d = C // n_head
    assert d % 2 == 0
    rows = B * T
    dtype = x.dtype

    # ---- QKV projection (Pallas matmul) ----
    qkv = pallas_matmul(x.reshape(rows, C), w_qkv)                  # (rows,3C)
    qkv = qkv.reshape(B, T, 3, n_head, d).transpose(2, 0, 3, 1, 4)  # (3,B,H,T,d)
    bh = B * n_head
    q = qkv[0].reshape(bh, T, d)
    k = qkv[1].reshape(bh, T, d)
    v = qkv[2].reshape(bh, T, d)

    # ---- rotary tables (match the PyTorch Rotary module) + pre-rotation ----
    inv_freq = 1.0 / (10000.0 ** (jnp.arange(0, d, 2, dtype=jnp.float32) / d))
    freqs = jnp.outer(jnp.arange(T, dtype=jnp.float32), inv_freq)   # (T, d/2)
    q, k = pallas_rotary_qk(q, k, jnp.cos(freqs), jnp.sin(freqs),
                            1.0 / math.sqrt(d))

    # ---- pack heads per attention block (lane density / fewer grid steps) --
    hb = _pick_head_block(n_head, d)
    g = n_head // hb
    bg = B * g

    def group(u):          # (B*H, T, d) -> (B*G, Hb, T, d); free reshape
        return u.reshape(bg, hb, T, d)

    qg, kg, vg = group(q), group(k), group(v)

    # ---- causal flat schedule: only lower-triangular (q_tile, kv_tile) -----
    sub = _sublane_mult(dtype)
    tq = _largest_divisor_tile(T, tq_target, sub)
    tkv = _largest_divisor_tile(T, tkv_target, sub)
    nq, nkv = T // tq, T // tkv
    sched = [(qi, ki) for qi in range(nq) for ki in range(nkv)
             if ki * tkv < (qi + 1) * tq]
    nsteps = len(sched)
    qi_ids = jnp.array([p[0] for p in sched], dtype=jnp.int32)
    ki_ids = jnp.array([p[1] for p in sched], dtype=jnp.int32)
    first = jnp.array([1 if p[1] == 0 else 0 for p in sched], dtype=jnp.int32)
    last = jnp.array(
        [1 if (i == nsteps - 1 or sched[i + 1][0] != p[0]) else 0
         for i, p in enumerate(sched)], dtype=jnp.int32)

    bq = jnp.dtype(dtype).itemsize
    est = (hb * tq * d * bq + 2 * hb * tkv * d * bq + hb * tq * d * bq
           + hb * tq * (d + 2) * 4)

    y = pl.pallas_call(
        _flash_kernel,
        out_shape=jax.ShapeDtypeStruct((bg, hb, T, d), dtype),
        grid_spec=pltpu.PrefetchScalarGridSpec(
            num_scalar_prefetch=4,
            grid=(bg, nsteps),
            in_specs=[
                pl.BlockSpec((1, hb, tq, d),
                             lambda b, s, qi, ki, fi, la: (b, 0, qi[s], 0)),
                pl.BlockSpec((1, hb, tkv, d),
                             lambda b, s, qi, ki, fi, la: (b, 0, ki[s], 0)),
                pl.BlockSpec((1, hb, tkv, d),
                             lambda b, s, qi, ki, fi, la: (b, 0, ki[s], 0)),
            ],
            out_specs=pl.BlockSpec(
                (1, hb, tq, d),
                lambda b, s, qi, ki, fi, la: (b, 0, qi[s], 0)),
            scratch_shapes=[pltpu.VMEM((hb, tq, 1), jnp.float32),   # run max
                            pltpu.VMEM((hb, tq, 1), jnp.float32),   # run sum
                            pltpu.VMEM((hb, tq, d), jnp.float32)],  # acc
        ),
        compiler_params=pltpu.CompilerParams(
            dimension_semantics=("parallel", "arbitrary"),
            vmem_limit_bytes=_vmem_limit(est)),
    )(qi_ids, ki_ids, first, last, qg, kg, vg)

    # ---- merge heads + output projection (Pallas matmul) ----
    y = (y.reshape(B, n_head, T, d)
          .transpose(0, 2, 1, 3)
          .reshape(rows, C))
    out = pallas_matmul(y, w_proj)
    return out.reshape(B, T, C)


# ----------------------------------------------------------------------------
# pure-JAX reference (mirrors the PyTorch module)
# ----------------------------------------------------------------------------
def _reference(x, w_qkv, w_proj, n_head):
    B, T, C = x.shape
    d = C // n_head
    qkv = x @ w_qkv
    q, k, v = qkv[..., :C], qkv[..., C:2 * C], qkv[..., 2 * C:]
    q = q.reshape(B, T, n_head, d)
    k = k.reshape(B, T, n_head, d)
    v = v.reshape(B, T, n_head, d)

    inv_freq = 1.0 / (10000.0 ** (jnp.arange(0, d, 2, dtype=jnp.float32) / d))
    freqs = jnp.outer(jnp.arange(T, dtype=jnp.float32), inv_freq)
    cos = jnp.cos(freqs)[None, :, None, :]
    sin = jnp.sin(freqs)[None, :, None, :]

    def rot(u):
        u1, u2 = u[..., :d // 2], u[..., d // 2:]
        return jnp.concatenate([u1 * cos + u2 * sin,
                                -u1 * sin + u2 * cos], axis=-1)

    q, k = rot(q), rot(k)
    q = q.transpose(0, 2, 1, 3)
    k = k.transpose(0, 2, 1, 3)
    v = v.transpose(0, 2, 1, 3)
    s = jnp.einsum("bhqd,bhkd->bhqk", q, k) / math.sqrt(d)
    mask = jnp.tril(jnp.ones((T, T), dtype=bool))
    s = jnp.where(mask[None, None], s, -jnp.inf)
    p = jax.nn.softmax(s, axis=-1)
    y = jnp.einsum("bhqk,bhkd->bhqd", p, v)
    y = y.transpose(0, 2, 1, 3).reshape(B, T, C)
    return y @ w_proj


if __name__ == "__main__":
    # Small config consistent with the module: batch=2, seq=16, n_embd=64,
    # n_head=4 (head_dim=16).
    B, T, n_head, n_embd = 2, 16, 4, 64
    C = n_embd

    key = jax.random.PRNGKey(0)
    kx, kq, kp = jax.random.split(key, 3)

    x = jax.random.normal(kx, (B, T, C), dtype=jnp.float32)
    bound = 1.0 / math.sqrt(C)
    # Linear weights, stored transposed vs. torch (so kernels do x @ W).
    w_qkv = jax.random.uniform(kq, (C, 3 * C), jnp.float32, -bound, bound)
    w_proj = jax.random.uniform(kp, (C, C), jnp.float32, -bound, bound)

    out = causal_self_attention(x, w_qkv, w_proj, n_head)
    jax.block_until_ready(out)

    ref = _reference(x, w_qkv, w_proj, n_head)
    assert out.shape == (B, T, C)
    max_err = float(jnp.max(jnp.abs(out - ref)))
    assert jnp.allclose(out, ref, atol=2e-3, rtol=2e-3), \
        f"mismatch vs reference (max abs err {max_err})"

    print("KERNEL_OK")
</pallas_src>

<mosaic_0001>
module attributes {stable_mosaic.version = 11 : i64} {
  func.func @_matmul_kernel(%arg0: i32, %arg1: i32, %arg2: i32, %arg3: memref<32x64xf32, #tpu.memory_space<vmem>>, %arg4: memref<64x192xf32, #tpu.memory_space<vmem>>, %arg5: memref<32x192xf32, #tpu.memory_space<vmem>>, %arg6: memref<32x192xf32, #tpu.memory_space<vmem>>) attributes {dimension_semantics = [#tpu.dimension_semantics<parallel>, #tpu.dimension_semantics<parallel>, #tpu.dimension_semantics<arbitrary>], iteration_bounds = array<i64: 1, 1, 1>, scalar_prefetch = 0 : i64, scratch_operands = 1 : i64, tpu.core_type = #tpu.core_type<tc>, window_params = [{transform_indices = @transform_0, window_bounds = array<i64: 32, 64>}, {transform_indices = @transform_1, window_bounds = array<i64: 64, 192>}, {transform_indices = @transform_2, window_bounds = array<i64: 32, 192>}]} {
    %c0_i32 = arith.constant 0 : i32
    %0 = arith.cmpi eq, %arg2, %c0_i32 : i32
    %1 = arith.extui %0 : i1 to i32
    %c0_i32_0 = arith.constant 0 : i32
    %2 = arith.cmpi ne, %1, %c0_i32_0 : i32
    scf.if %2 {
      %cst_10 = arith.constant 0.000000e+00 : f32
      %12 = vector.broadcast %cst_10 : f32 to vector<32x192xf32>
      %c0_11 = arith.constant 0 : index
      %c0_12 = arith.constant 0 : index
      %13 = vector.load %arg6[%c0_11, %c0_12] : memref<32x192xf32, #tpu.memory_space<vmem>>, vector<32x192xf32>
      tpu.vector_store %arg6[%c0_11, %c0_12], %12 {strides = array<i32>} : memref<32x192xf32, #tpu.memory_space<vmem>>, vector<32x192xf32>,
    } else {
    }
    %c0 = arith.constant 0 : index
    %c0_1 = arith.constant 0 : index
    %3 = vector.load %arg6[%c0, %c0_1] : memref<32x192xf32, #tpu.memory_space<vmem>>, vector<32x192xf32>
    %c0_2 = arith.constant 0 : index
    %c0_3 = arith.constant 0 : index
    %4 = vector.load %arg3[%c0_2, %c0_3] : memref<32x64xf32, #tpu.memory_space<vmem>>, vector<32x64xf32>
    %c0_4 = arith.constant 0 : index
    %c0_5 = arith.constant 0 : index
    %5 = vector.load %arg4[%c0_4, %c0_5] : memref<64x192xf32, #tpu.memory_space<vmem>>, vector<64x192xf32>
    %cst = arith.constant dense<0.000000e+00> : vector<32x192xf32>
    %6 = tpu.matmul %4, %5, %cst {dimension_numbers = #tpu.dot_dimension_numbers<[1], [0], [0], [1], [0, 0, 1, 1], [], []>} : vector<32x64xf32>, vector<64x192xf32>, vector<32x192xf32> -> vector<32x192xf32>
    %7 = arith.addf %3, %6 : vector<32x192xf32>
    %c0_6 = arith.constant 0 : index
    %c0_7 = arith.constant 0 : index
    %8 = vector.load %arg6[%c0_6, %c0_7] : memref<32x192xf32, #tpu.memory_space<vmem>>, vector<32x192xf32>
    tpu.vector_store %arg6[%c0_6, %c0_7], %7 {strides = array<i32>} : memref<32x192xf32, #tpu.memory_space<vmem>>, vector<32x192xf32>,
    %c0_i32_8 = arith.constant 0 : i32
    %9 = arith.cmpi eq, %arg2, %c0_i32_8 : i32
    %10 = arith.extui %9 : i1 to i32
    %c0_i32_9 = arith.constant 0 : i32
    %11 = arith.cmpi ne, %10, %c0_i32_9 : i32
    scf.if %11 {
      %c0_10 = arith.constant 0 : index
      %c0_11 = arith.constant 0 : index
      %12 = vector.load %arg6[%c0_10, %c0_11] : memref<32x192xf32, #tpu.memory_space<vmem>>, vector<32x192xf32>
      %c0_12 = arith.constant 0 : index
      %c0_13 = arith.constant 0 : index
      %13 = vector.load %arg5[%c0_12, %c0_13] : memref<32x192xf32, #tpu.memory_space<vmem>>, vector<32x192xf32>
      tpu.vector_store %arg5[%c0_12, %c0_13], %12 {strides = array<i32>} : memref<32x192xf32, #tpu.memory_space<vmem>>, vector<32x192xf32>,
    } else {
    }
    return
  }
  func.func @transform_0(%arg0: i32, %arg1: i32, %arg2: i32) -> (i32, i32) {
    %c0_i32 = arith.constant 0 : i32
    return %arg0, %arg2 : i32, i32
  }
  func.func @transform_1(%arg0: i32, %arg1: i32, %arg2: i32) -> (i32, i32) {
    %c0_i32 = arith.constant 0 : i32
    return %arg2, %arg1 : i32, i32
  }
  func.func @transform_2(%arg0: i32, %arg1: i32, %arg2: i32) -> (i32, i32) {
    %c0_i32 = arith.constant 0 : i32
    return %arg0, %arg1 : i32, i32
  }
}

</mosaic_0001>

<bundles_post_ra>
// kernel: tpu_custom_call.1
= control target key start
LH: loop header
LB: loop body
LE: loop exit
PB: predicated region body
PF: predicated region fallthrough
CT: control target
= control target key end

     0   :  { %7 = vsyncpa [#allocation4], 0  ;;  %s379_s0 = inlined_call_operand.hbm [shape: f32[32,64], index: 0, kind: input, shape index: {}]   ;;  %s380_s1 = inlined_call_operand.hbm [shape: f32[64,192], index: 1, kind: input, shape index: {}]   ;;  %s381_s2 = inlined_call_operand.hbm [shape: f32[32,192], index: 2, kind: output, shape index: {}]  }
   0x1   :  { %8 = vsyncpa [#allocation7], 0 }
   0x2   :  { %9 = vsyncpa [#allocation5], 0  ;;  %s14_s11 = sshll.u32 %s379_s0, 4  ;;  %s321_s12 = smov [#allocation3]   ;;  %s15_s11 = int_to_ptr.hbm [resolvable:$true] %s14_s11 }
   0x3   :  { %s16_s13 = sshll.u32 %s321_s12, 4  ;;  %s27_s16 = sshll.u32 %s380_s1, 4  ;;  %s17_s13 = int_to_ptr.vmem [resolvable:$true] %s16_s13  ;;  %s28_s16 = int_to_ptr.hbm [resolvable:$true] %s27_s16 }
   0x4   :  { %s322_s17 = smov 128   ;;  %s323_s18 = smov 8  }
   0x5   :  { %22 = dma.hbm_to_vmem [thread:$0]  %s15_s11, 512, %s17_s13, [#allocation4], %s322_s17, %s322_s17, %s323_s18  }
   0x6   :  { %s324_s19 = smov [#allocation6]   ;;  %s325_s21 = smov 256  }
   0x7   :  { %s29_s20 = sshll.u32 %s324_s19, 4  ;;  %s326_s22 = smov 16   ;;  %s30_s20 = int_to_ptr.vmem [resolvable:$true] %s29_s20 }
   0x8   :  { %35 = dma.hbm_to_vmem [thread:$0]  %s28_s16, 2048, %s30_s20, [#allocation7], %s325_s21, %s325_s21, %s326_s22  }
   0x9   :  { %315 = dma.done.wait [#allocation4], 512  }
   0xa   :  { %316 = vsyncadd [#allocation4], 4294966784 }
   0xb   :  { %317 = dma.done.wait [#allocation7], 2048  }
   0xc   :  { %318 = vsyncadd [#allocation7], 4294965248  ;;  %vm49_vm0 = vcmask 523264   ;;  %v327_v0 = vmov 0.0   ;;  %v83_v1 = vld [vmem:[#allocation6 + $0x70] sm:$0xff]  ;;  %v84_v2 = vld [vmem:[#allocation6 + $0x78] sm:$0xff] }
   0xd   :  { %50 = vst.msk [vmem:[#allocation2 + $0x8] sm:$0xff] %vm49_vm0, %v327_v0  ;;  %v81_v3 = vld [vmem:[#allocation6 + $0x60] sm:$0xff]  ;;  %219 = vmatpush.msra.mxu2 %v83_v1  ;;  %227 = vmatpush.msra.mxu3 %v84_v2  ;;  %v82_v4 = vld [vmem:[#allocation6 + $0x68] sm:$0xff]  ;;  %v79_v5 = vld [vmem:[#allocation6 + $0x50] sm:$0xff]  ;;  %s328_s0 = smov [#allocation8]   ;;  %s197_s25 = sshll.u32 %s381_s2, 4  ;;  %s198_s25 = int_to_ptr.hbm [resolvable:$true] %s197_s25 }
   0xe   :  { %52 = vst.msk [vmem:[#allocation2 + $0x18] sm:$0xff] %vm49_vm0, %v327_v0  ;;  %v80_v6 = vld [vmem:[#allocation6 + $0x58] sm:$0xff]  ;;  %106 = vmatpush.msra.mxu0 %v83_v1  ;;  %135 = vmatpush.msra.mxu1 %v84_v2  ;;  %v77_v7 = vld [vmem:[#allocation6 + $0x40] sm:$0xff]  ;;  %v78_v8 = vld [vmem:[#allocation6 + $0x48] sm:$0xff]  ;;  %s195_s1 = sshll.u32 %s328_s0, 4  ;;  %s196_s1 = int_to_ptr.vmem [resolvable:$true] %s195_s1 }
   0xf   :  { %54 = vst.msk [vmem:[#allocation2 + $0x28] sm:$0xff] %vm49_vm0, %v327_v0  ;;  %220 = vmatpush.msra.mxu2 %v81_v3  ;;  %228 = vmatpush.msra.mxu3 %v82_v4  ;;  %v75_v9 = vld [vmem:[#allocation6 + $0x30] sm:$0xff]  ;;  %v76_v10 = vld [vmem:[#allocation6 + $0x38] sm:$0xff]  ;;  %v73_v11 = vld [vmem:[#allocation6 + $0x20] sm:$0xff] }
  0x10   :  { %56 = vst.msk [vmem:[#allocation2 + $0x38] sm:$0xff] %vm49_vm0, %v327_v0  ;;  %107 = vmatpush.msra.mxu0 %v81_v3  ;;  %136 = vmatpush.msra.mxu1 %v82_v4  ;;  %v74_v12 = vld [vmem:[#allocation6 + $0x28] sm:$0xff]  ;;  %v71_v13 = vld [vmem:[#allocation6 + $0x10] sm:$0xff]  ;;  %v72_v14 = vld [vmem:[#allocation6 + $0x18] sm:$0xff] }
  0x11   :  { %221 = vmatpush.msra.mxu2 %v79_v5  ;;  %229 = vmatpush.msra.mxu3 %v80_v6  ;;  %v69_v15 = vld [vmem:[#allocation6] sm:$0xff]  ;;  %v70_v16 = vld [vmem:[#allocation6 + $0x8] sm:$0xff]  ;;  %v67_v17 = vld [vmem:[#allocation3 + $0x10] sm:$0xff] }
  0x12   :  { %108 = vmatpush.msra.mxu0 %v79_v5  ;;  %137 = vmatpush.msra.mxu1 %v80_v6  ;;  %v65_v18 = vld [vmem:[#allocation3] sm:$0xff]  ;;  %v68_v19 = vld [vmem:[#allocation3 + $0x18] sm:$0xff]  ;;  %v66_v20 = vld [vmem:[#allocation3 + $0x8] sm:$0xff] }
  0x13   :  { %222 = vmatpush.msra.mxu2 %v77_v7  ;;  %230 = vmatpush.msra.mxu3 %v78_v8 }
  0x14   :  { %109 = vmatpush.msra.mxu0 %v77_v7  ;;  %138 = vmatpush.msra.mxu1 %v78_v8  ;;  %v58_v21 = vld [vmem:[#allocation2 + $0x8] sm:$0xff] }
  0x15   :  { %223 = vmatpush.msra.mxu2 %v75_v9  ;;  %231 = vmatpush.msra.mxu3 %v76_v10  ;;  %v60_v29 = vld [vmem:[#allocation2 + $0x18] sm:$0xff] }
  0x16   :  { %110 = vmatpush.msra.mxu0 %v75_v9  ;;  %139 = vmatpush.msra.mxu1 %v76_v10  ;;  %v62_v25 = vld [vmem:[#allocation2 + $0x28] sm:$0xff] }
  0x17   :  { %224 = vmatpush.msra.mxu2 %v73_v11  ;;  %232 = vmatpush.msra.mxu3 %v74_v12  ;;  %v64_v33 = vld [vmem:[#allocation2 + $0x38] sm:$0xff] }
  0x18   :  { %111 = vmatpush.msra.mxu0 %v73_v11  ;;  %140 = vmatpush.msra.mxu1 %v74_v12 }
  0x19   :  { %225 = vmatpush.msra.mxu2 %v71_v13  ;;  %233 = vmatpush.msra.mxu3 %v72_v14 }
  0x1a   :  { %112 = vmatpush.msra.mxu0 %v71_v13  ;;  %141 = vmatpush.msra.mxu1 %v72_v14 }
  0x1b   :  { %226 = vmatpush.msra.mxu2 %v69_v15  ;;  %234 = vmatpush.msra.mxu3 %v70_v16 }
  0x1c   :  { %213 = vmatmul.msk.f32.vlgmr.msra.gmra.mxu2 %vm49_vm0, %v67_v17  ;;  %217 = vmatmul.msk.f32.vlgmr.msra.gmra.mxu3 %vm49_vm0, %v67_v17 }
  0x1d   :  { %113 = vmatpush.msra.mxu0 %v69_v15  ;;  %142 = vmatpush.msra.mxu1 %v70_v16 }
  0x1e   :  { %211 = vmatmul.msk.f32.vlgmr.msra.gmra.mxu0 %vm49_vm0, %v65_v18  ;;  %215 = vmatmul.msk.f32.vlgmr.msra.gmra.mxu1 %vm49_vm0, %v65_v18 }
  0x24   :  { %214 = vmatmul.msk.f32.gmra.mxu2 %vm49_vm0, %v68_v19  ;;  %218 = vmatmul.msk.f32.gmra.mxu3 %vm49_vm0, %v68_v19 }
  0x26   :  { %212 = vmatmul.msk.f32.gmra.mxu0 %vm49_vm0, %v66_v20  ;;  %216 = vmatmul.msk.f32.gmra.mxu1 %vm49_vm0, %v66_v20 }
  0x9b   :  { %v115_v22 = vpop.f32.mrf.mxu0  ;;  %v144_v23 = vpop.f32.mrf.mxu1 }
  0x9c   :  { %v157_v24 = vadd.f32 %v144_v23, %v58_v21  ;;  %183 = vst [vmem:[#allocation8] sm:$0xff] %v115_v22 }
  0x9e   :  { %165 = vst.msk [vmem:[#allocation2 + $0x8] sm:$0xff] %vm49_vm0, %v157_v24 }
  0x9f   :  { %v121_v26 = vpop.f32.mrf.mxu2  ;;  %v150_v27 = vpop.f32.mrf.mxu3 }
  0xa0   :  { %v161_v28 = vadd.f32 %v150_v27, %v62_v25  ;;  %187 = vst [vmem:[#allocation8 + $0x20] sm:$0xff] %v121_v26 }
  0xa2   :  { %169 = vst.msk [vmem:[#allocation2 + $0x28] sm:$0xff] %vm49_vm0, %v161_v28 }
  0xa3   :  { %v118_v30 = vpop.f32.mrf.mxu0  ;;  %v147_v31 = vpop.f32.mrf.mxu1 }
  0xa4   :  { %v159_v32 = vadd.f32 %v147_v31, %v60_v29  ;;  %185 = vst [vmem:[#allocation8 + $0x10] sm:$0xff] %v118_v30 }
  0xa5   :  { %v176_v34 = vld [vmem:[#allocation2 + $0x8] sm:$0xff] }
  0xa6   :  { %167 = vst.msk [vmem:[#allocation2 + $0x18] sm:$0xff] %vm49_vm0, %v159_v32 }
  0xa7   :  { %v124_v35 = vpop.f32.mrf.mxu2  ;;  %v153_v36 = vpop.f32.mrf.mxu3  ;;  %184 = vst.msk [vmem:[#allocation8 + $0x8] sm:$0xff] %vm49_vm0, %v176_v34 }
  0xa8   :  { %v163_v37 = vadd.f32 %v153_v36, %v64_v33  ;;  %189 = vst [vmem:[#allocation8 + $0x30] sm:$0xff] %v124_v35 }
  0xa9   :  { %v180_v38 = vld [vmem:[#allocation2 + $0x28] sm:$0xff] }
  0xaa   :  { %171 = vst.msk [vmem:[#allocation2 + $0x38] sm:$0xff] %vm49_vm0, %v163_v37 }
  0xab   :  { %188 = vst.msk [vmem:[#allocation8 + $0x28] sm:$0xff] %vm49_vm0, %v180_v38 }
  0xad   :  { %v178_v39 = vld [vmem:[#allocation2 + $0x18] sm:$0xff] }
  0xae   :  { %186 = vst.msk [vmem:[#allocation8 + $0x18] sm:$0xff] %vm49_vm0, %v178_v39 }
  0xb1   :  { %v182_v40 = vld [vmem:[#allocation2 + $0x38] sm:$0xff] }
  0xb2   :  { %190 = vst.msk [vmem:[#allocation8 + $0x38] sm:$0xff] %vm49_vm0, %v182_v40 }
  0xb3   :  { %203 = dma.vmem_to_hbm [thread:$0]  %s196_s1, 1024, %s198_s25, [#allocation5], %s325_s21, %s325_s21, %s326_s22  }
  0xb4   :  { %319 = dma.done.wait [#allocation5], 1024  }
  0xb5   :  { %320 = vsyncadd [#allocation5], 4294966272 }
  0xb6   :  { %208 = vsyncpa [#allocation4], 1 }
  0xb7   :  { %209 = vsyncpa [#allocation7], 1 }
  0xb8   :  { %210 = vsyncpa [#allocation5], 1 }

</bundles_post_ra>
